<compile_context>
chip_gen: v6e
topology: v6e:2x2x1
jax: 0.10.0
libtpu: 0.0.40
codegen_flags: <defaults>
</compile_context>

<pallas_src>
import functools

import jax
import jax.numpy as jnp
from jax.experimental import pallas as pl
from jax.experimental.pallas import tpu as pltpu


def _cre_kernel(yhat_ref, y_ref, out_ref, *, K, psi, kush, n_rows, block_rows):
    logits = yhat_ref[...].astype(jnp.float32)            # (TN, C)
    TN, C = logits.shape

    # Mask rows that fall past the true batch size (ragged last tile). Zeroing
    # the logits keeps exp/log finite on the padded rows; their contribution is
    # zeroed again below.
    row0 = pl.program_id(0) * block_rows
    row_ids = row0 + jax.lax.broadcasted_iota(jnp.int32, (TN, 1), 0)
    valid = row_ids < n_rows                               # (TN, 1) bool
    logits = jnp.where(valid, logits, 0.0)

    # softmax over classes (numerically stable); exact reciprocal of the
    # (TN, 1) row sum is cheap and precision-safe.
    m = jnp.max(logits, axis=1, keepdims=True)
    ex = jnp.exp(logits - m)
    inv_rowsum = 1.0 / jnp.sum(ex, axis=1, keepdims=True)  # (TN, 1)
    p = ex * inv_rowsum                                    # (TN, C)

    # norm = K*p + psi*K + kush  (psi array folded into a scalar constant);
    # one per-element reciprocal reused for both entropy terms.
    pK = K * p
    norm = pK + (psi * K + kush)
    inv_norm = 1.0 / norm                                  # single per-elem divide
    a = pK * inv_norm                                      # == pK / norm
    b = psi * inv_norm                                     # == VP / norm
    e = a * jnp.log(a + kush) + (b * jnp.log(b + kush)) * K

    # ground-truth mask (boolean, no float one-hot materialized)
    y = y_ref[...]                                         # (TN, 1) int32
    col = jax.lax.broadcasted_iota(jnp.int32, (TN, C), 1)
    is_gt = col == y                                       # (TN, C) bool

    e = jnp.where(is_gt, 0.0, e)                           # zero-hot masking
    e_row = jnp.sum(e, axis=1, keepdims=True)              # (TN, 1)
    p_gt = jnp.sum(jnp.where(is_gt, p, 0.0), axis=1, keepdims=True)

    contrib = jnp.where(valid, e_row * (p_gt + kush), 0.0)
    total = jnp.sum(contrib)                               # per-tile partial sum

    # Write the partial sum into this tile's own (8, 128) output block
    # (element [0, 0]; the rest zero). Lane-aligned block => unmasked stores,
    # and distinct blocks per grid step keep the axis safely "parallel".
    sub = jax.lax.broadcasted_iota(jnp.int32, (8, 128), 0)
    lane = jax.lax.broadcasted_iota(jnp.int32, (8, 128), 1)
    out_ref[...] = jnp.where((sub == 0) & (lane == 0), total, 0.0)


def _round_up(x, m):
    return ((x + m - 1) // m) * m


def _pick_block_rows(N, C):
    # Keep one f32 (TN, C) tile around ~2 MiB so double-buffered inputs plus a
    # few f32 temporaries stay well inside a 32 MiB scoped-VMEM budget (also
    # comfortable on v7x's 64 MiB physical VMEM).
    budget_bytes = 2 * 1024 * 1024
    tn = budget_bytes // max(1, 4 * C)
    tn = max(8, min(1024, (tn // 8) * 8))
    return min(tn, _round_up(N, 8))


def cre_pallas(yhat, y, K=3, psi=1e-7, kush=1e-7, block_rows=None):
    N, C = yhat.shape
    y2 = y.reshape(N, 1).astype(jnp.int32)
    if block_rows is None:
        block_rows = _pick_block_rows(N, C)
    num_tiles = pl.cdiv(N, block_rows)

    kernel = functools.partial(
        _cre_kernel, K=K, psi=psi, kush=kush, n_rows=N, block_rows=block_rows
    )

    partials = pl.pallas_call(
        kernel,
        grid=(num_tiles,),
        in_specs=[
            pl.BlockSpec((block_rows, C), lambda i: (i, 0)),   # logits tile
            pl.BlockSpec((block_rows, 1), lambda i: (i, 0)),   # labels tile
        ],
        out_specs=pl.BlockSpec((8, 128), lambda i: (i, 0)),    # per-tile partial
        out_shape=jax.ShapeDtypeStruct((num_tiles * 8, 128), jnp.float32),
        compiler_params=pltpu.CompilerParams(
            dimension_semantics=("parallel",),
            vmem_limit_bytes=32 * 1024 * 1024,
        ),
    )(yhat, y2)  # NOTE: no pre-cast — logits travel over HBM in their own dtype

    # Tiny final reduction + GLOBAL normalization in plain JAX.
    return jnp.sum(partials) / (N * C)


def cre_ref(yhat, y, K=3, psi=1e-7, kush=1e-7):
    """Pure-JAX reference mirroring the PyTorch forward."""
    N, C = yhat.shape
    p = jax.nn.softmax(yhat.astype(jnp.float32), axis=1)
    pK = K * p
    vp = jnp.full_like(p, psi)
    norm = pK + vp * K + kush
    e = (pK / norm) * jnp.log(pK / norm + kush)
    e = e + (vp / norm) * jnp.log(vp / norm + kush) * K
    onehot = jax.nn.one_hot(y, C, dtype=jnp.float32)
    e = e * (1.0 - onehot)
    e_row = jnp.sum(e, axis=1)
    p_gt = jnp.sum(p * onehot, axis=1)
    return jnp.sum(e_row * (p_gt + kush)) / (N * C)


if __name__ == "__main__":
    # Hyper-parameters (deterministic, in-script)
    K = 3
    psi = 1e-7

    key = jax.random.PRNGKey(0)

    # Case 1: small shapes implied by the forward (N, C) logits, (N,) labels.
    N, C = 8, 32
    k1, k2, key = jax.random.split(key, 3)
    yhat = jax.random.normal(k1, (N, C), dtype=jnp.float32)
    y = jax.random.randint(k2, (N,), 0, C, dtype=jnp.int32)

    out = jax.block_until_ready(cre_pallas(yhat, y, K=K, psi=psi))
    ref = cre_ref(yhat, y, K=K, psi=psi)
    assert jnp.allclose(out, ref, atol=1e-5, rtol=1e-5), (out, ref)

    # Case 2: multi-tile grid with a ragged last tile (exercises the row mask
    # and the parallel per-tile partial-sum reduction).
    N2, C2 = 100, 48
    k3, k4, key = jax.random.split(key, 3)
    yhat2 = jax.random.normal(k3, (N2, C2), dtype=jnp.float32)
    y_lbl2 = jax.random.randint(k4, (N2,), 0, C2, dtype=jnp.int32)

    out2 = jax.block_until_ready(
        cre_pallas(yhat2, y_lbl2, K=K, psi=psi, block_rows=32)
    )
    ref2 = cre_ref(yhat2, y_lbl2, K=K, psi=psi)
    assert jnp.allclose(out2, ref2, atol=1e-5, rtol=1e-5), (out2, ref2)

    print("KERNEL_OK")
</pallas_src>

<mosaic_0001>
module attributes {stable_mosaic.version = 11 : i64} {
  func.func @_cre_kernel(%arg0: i32, %arg1: memref<8x32xf32, #tpu.memory_space<vmem>>, %arg2: memref<8x1xi32, #tpu.memory_space<vmem>>, %arg3: memref<8x128xf32, #tpu.memory_space<vmem>>) attributes {dimension_semantics = [#tpu.dimension_semantics<parallel>], iteration_bounds = array<i64: 1>, scalar_prefetch = 0 : i64, scratch_operands = 0 : i64, tpu.core_type = #tpu.core_type<tc>, window_params = [{transform_indices = @transform_0, window_bounds = array<i64: 8, 32>}, {transform_indices = @transform_1, window_bounds = array<i64: 8, 1>}, {transform_indices = @transform_2, window_bounds = array<i64: 8, 128>}]} {
    %c0 = arith.constant 0 : index
    %c0_0 = arith.constant 0 : index
    %0 = vector.load %arg1[%c0, %c0_0] : memref<8x32xf32, #tpu.memory_space<vmem>>, vector<8x32xf32>
    %c8_i32 = arith.constant 8 : i32
    %1 = arith.muli %arg0, %c8_i32 : i32
    %2 = tpu.iota {dimensions = array<i32: 0>} : vector<8x1xi32>
    %3 = vector.broadcast %1 : i32 to vector<8x1xi32>
    %4 = arith.addi %3, %2 : vector<8x1xi32>
    %c8_i32_1 = arith.constant 8 : i32
    %5 = vector.broadcast %c8_i32_1 : i32 to vector<8x1xi32>
    %6 = arith.cmpi slt, %4, %5 : vector<8x1xi32>
    %cst = arith.constant 0.000000e+00 : f32
    %7 = vector.shape_cast %6 : vector<8x1xi1> to vector<8x1xi1>
    %8 = vector.broadcast %7 : vector<8x1xi1> to vector<8x32xi1>
    %9 = vector.broadcast %cst : f32 to vector<8x32xf32>
    %10 = arith.select %8, %0, %9 : vector<8x32xi1>, vector<8x32xf32>
    %cst_2 = arith.constant dense<0xFF800000> : vector<8xf32>
    %11 = vector.multi_reduction <maximumf>, %10, %cst_2 [1] : vector<8x32xf32> to vector<8xf32>
    %12 = vector.shape_cast %11 : vector<8xf32> to vector<8x1xf32>
    %13 = vector.broadcast %12 : vector<8x1xf32> to vector<8x32xf32>
    %14 = arith.subf %10, %13 : vector<8x32xf32>
    %15 = math.exp %14 : vector<8x32xf32>
    %cst_3 = arith.constant dense<0.000000e+00> : vector<8xf32>
    %16 = vector.multi_reduction <add>, %15, %cst_3 [1] : vector<8x32xf32> to vector<8xf32>
    %17 = vector.shape_cast %16 : vector<8xf32> to vector<8x1xf32>
    %cst_4 = arith.constant 1.000000e+00 : f32
    %18 = vector.broadcast %cst_4 : f32 to vector<8x1xf32>
    %19 = arith.divf %18, %17 : vector<8x1xf32>
    %20 = vector.broadcast %19 : vector<8x1xf32> to vector<8x32xf32>
    %21 = arith.mulf %15, %20 : vector<8x32xf32>
    %cst_5 = arith.constant 3.000000e+00 : f32
    %22 = vector.broadcast %cst_5 : f32 to vector<8x32xf32>
    %23 = arith.mulf %22, %21 : vector<8x32xf32>
    %cst_6 = arith.constant 4.000000e-07 : f32
    %24 = vector.broadcast %cst_6 : f32 to vector<8x32xf32>
    %25 = arith.addf %23, %24 : vector<8x32xf32>
    %cst_7 = arith.constant 1.000000e+00 : f32
    %26 = vector.broadcast %cst_7 : f32 to vector<8x32xf32>
    %27 = arith.divf %26, %25 : vector<8x32xf32>
    %28 = arith.mulf %23, %27 : vector<8x32xf32>
    %cst_8 = arith.constant 1.000000e-07 : f32
    %29 = vector.broadcast %cst_8 : f32 to vector<8x32xf32>
    %30 = arith.mulf %29, %27 : vector<8x32xf32>
    %cst_9 = arith.constant 1.000000e-07 : f32
    %31 = vector.broadcast %cst_9 : f32 to vector<8x32xf32>
    %32 = arith.addf %28, %31 : vector<8x32xf32>
    %33 = math.log %32 : vector<8x32xf32>
    %34 = arith.mulf %28, %33 : vector<8x32xf32>
    %cst_10 = arith.constant 1.000000e-07 : f32
    %35 = vector.broadcast %cst_10 : f32 to vector<8x32xf32>
    %36 = arith.addf %30, %35 : vector<8x32xf32>
    %37 = math.log %36 : vector<8x32xf32>
    %38 = arith.mulf %30, %37 : vector<8x32xf32>
    %cst_11 = arith.constant 3.000000e+00 : f32
    %39 = vector.broadcast %cst_11 : f32 to vector<8x32xf32>
    %40 = arith.mulf %38, %39 : vector<8x32xf32>
    %41 = arith.addf %34, %40 : vector<8x32xf32>
    %c0_12 = arith.constant 0 : index
    %c0_13 = arith.constant 0 : index
    %42 = vector.load %arg2[%c0_12, %c0_13] : memref<8x1xi32, #tpu.memory_space<vmem>>, vector<8x1xi32>
    %43 = tpu.iota {dimensions = array<i32: 1>} : vector<8x32xi32>
    %44 = vector.broadcast %42 : vector<8x1xi32> to vector<8x32xi32>
    %45 = arith.cmpi eq, %43, %44 : vector<8x32xi32>
    %cst_14 = arith.constant 0.000000e+00 : f32
    %46 = vector.broadcast %cst_14 : f32 to vector<8x32xf32>
    %47 = arith.select %45, %46, %41 : vector<8x32xi1>, vector<8x32xf32>
    %cst_15 = arith.constant dense<0.000000e+00> : vector<8xf32>
    %48 = vector.multi_reduction <add>, %47, %cst_15 [1] : vector<8x32xf32> to vector<8xf32>
    %49 = vector.shape_cast %48 : vector<8xf32> to vector<8x1xf32>
    %cst_16 = arith.constant 0.000000e+00 : f32
    %50 = vector.broadcast %cst_16 : f32 to vector<8x32xf32>
    %51 = arith.select %45, %21, %50 : vector<8x32xi1>, vector<8x32xf32>
    %cst_17 = arith.constant dense<0.000000e+00> : vector<8xf32>
    %52 = vector.multi_reduction <add>, %51, %cst_17 [1] : vector<8x32xf32> to vector<8xf32>
    %53 = vector.shape_cast %52 : vector<8xf32> to vector<8x1xf32>
    %cst_18 = arith.constant 1.000000e-07 : f32
    %54 = vector.broadcast %cst_18 : f32 to vector<8x1xf32>
    %55 = arith.addf %53, %54 : vector<8x1xf32>
    %56 = arith.mulf %49, %55 : vector<8x1xf32>
    %cst_19 = arith.constant 0.000000e+00 : f32
    %57 = vector.broadcast %cst_19 : f32 to vector<8x1xf32>
    %58 = arith.select %6, %56, %57 : vector<8x1xi1>, vector<8x1xf32>
    %59 = vector.shape_cast %58 : vector<8x1xf32> to vector<1x8x1xf32>
    %cst_20 = arith.constant dense<0.000000e+00> : vector<1xf32>
    %60 = vector.multi_reduction <add>, %59, %cst_20 [1, 2] : vector<1x8x1xf32> to vector<1xf32>
    %61 = vector.shape_cast %60 : vector<1xf32> to vector<1x1x1xf32>
    %62 = vector.extract %61[0, 0, 0] : f32 from vector<1x1x1xf32>
    %63 = tpu.iota {dimensions = array<i32: 0>} : vector<8x128xi32>
    %64 = tpu.iota {dimensions = array<i32: 1>} : vector<8x128xi32>
    %c0_i32 = arith.constant 0 : i32
    %65 = vector.broadcast %c0_i32 : i32 to vector<8x128xi32>
    %66 = arith.cmpi eq, %63, %65 : vector<8x128xi32>
    %c0_i32_21 = arith.constant 0 : i32
    %67 = vector.broadcast %c0_i32_21 : i32 to vector<8x128xi32>
    %68 = arith.cmpi eq, %64, %67 : vector<8x128xi32>
    %69 = arith.andi %66, %68 : vector<8x128xi1>
    %cst_22 = arith.constant 0.000000e+00 : f32
    %70 = vector.broadcast %62 : f32 to vector<8x128xf32>
    %71 = vector.broadcast %cst_22 : f32 to vector<8x128xf32>
    %72 = arith.select %69, %70, %71 : vector<8x128xi1>, vector<8x128xf32>
    %c0_23 = arith.constant 0 : index
    %c0_24 = arith.constant 0 : index
    %73 = vector.load %arg3[%c0_23, %c0_24] : memref<8x128xf32, #tpu.memory_space<vmem>>, vector<8x128xf32>
    tpu.vector_store %arg3[%c0_23, %c0_24], %72 {strides = array<i32>} : memref<8x128xf32, #tpu.memory_space<vmem>>, vector<8x128xf32>,
    return
  }
  func.func @transform_0(%arg0: i32) -> (i32, i32) {
    %c0_i32 = arith.constant 0 : i32
    %c0_i32_0 = arith.constant 0 : i32
    return %arg0, %c0_i32 : i32, i32
  }
  func.func @transform_1(%arg0: i32) -> (i32, i32) {
    %c0_i32 = arith.constant 0 : i32
    %c0_i32_0 = arith.constant 0 : i32
    return %arg0, %c0_i32 : i32, i32
  }
  func.func @transform_2(%arg0: i32) -> (i32, i32) {
    %c0_i32 = arith.constant 0 : i32
    %c0_i32_0 = arith.constant 0 : i32
    return %arg0, %c0_i32 : i32, i32
  }
}

</mosaic_0001>

<bundles_post_ra>
// kernel: tpu_custom_call.1
= control target key start
LH: loop header
LB: loop body
LE: loop exit
PB: predicated region body
PF: predicated region fallthrough
CT: control target
= control target key end

     0   :  { %vm22_vm0 = vcmask 261120   ;;  %s170_s0 = inlined_call_operand.vmem [shape: f32[8,32], index: 0, kind: input, shape index: {}]   ;;  %s171_s1 = inlined_call_operand.vmem [shape: s32[8,1], index: 1, kind: input, shape index: {}]   ;;  %s172_s2 = inlined_call_operand.hbm [shape: f32[8,128], index: 2, kind: output, shape index: {}]  }
   0x1   :  { %v12_v0 = vld [vmem:[%s170_s0] sm:$0xff] }
   0x2   :  { %7 = vsyncpa [#allocation3], 0  ;;  %v23_v1 = vsel %vm22_vm0, %v12_v0, -inf  ;;  %v51_v2 = vld [vmem:[%s171_s1] sm:$0xff]  ;;  %v138_v3 = vmov 0   ;;  %v14_v10 = vlaneseq  ;;  %vm69_vm2 = vcmask 7168  }
   0x3   :  { %24 = vmax.xlane.f32.xlu0 %v23_v1  ;;  %104 = vset.pattern.permute.xlu1 %v138_v3  ;;  %s139_s0 = smov [#allocation2]  }
   0x4   :  { %105 = vset.pattern.permute.xlu0 %v138_v3  ;;  %55 = vperm.xlu1 %104, %v51_v2   ;;  %v53_v11 = vand.u32 127, %v14_v10  ;;  %v15_v46 = vshrl.u32 %v14_v10, 7  ;;  %s92_s1 = sshll.u32 %s139_s0, 4  ;;  %s93_s1 = int_to_ptr.vmem [resolvable:$true] %s92_s1 }
   0x5   :  { %s116_s14 = scalar_lea.vmem %s93_s1, 128  ;;  %p121_p1 = scmp.lt.s32.totalorder %s93_s1, %s93_s1 }
   0x6   :  { %vm80_vm3 = vcmp.eq.s32.totalorder %v15_v46, 0  ;;  %vm81_vm4 = vcmp.eq.s32.totalorder %v53_v11, 0  ;;  %p117_p0 = scmp.ne.s32.totalorder %s93_s1, %s116_s14  ;;  %p122_p2 = scmp.lt.s32.totalorder %s116_s14, %s116_s14 }
   0x7   :  { %vm82_vm5 = vmand %vm80_vm3, %vm81_vm4 }
   0x8   :  { %p123_p3 = por %p122_p2, %p121_p1 }
   0xa   :  { %p124_p4 = pnand %p123_p3, %p117_p0 }
  0x7f   :  { %v56_v12 = vpop.permute.xlu1 %55 }
  0x80   :  { %vm57_vm1 = vcmp.eq.s32.totalorder %v53_v11, %v56_v12 }
  0x8c   :  { %v25_v4 = vpop.xlane.xlu0 %24 }
  0x8d   :  { %v26_v5 = vsub.f32 %v12_v0, %v25_v4 }
  0x8f   :  { %v27_v6 = vmul.f32 1.442695, %v26_v5 }
  0x91   :  { %106 = vpow2.f32 %v27_v6 }
  0x9e   :  { %v107_v7 = vpop.eup %106 }
  0x9f   :  { %v29_v8 = vsel %vm22_vm0, %v107_v7, 0.0 }
  0xa0   :  { %30 = vadd.xlane.f32.xlu0 %v29_v8 }
 0x129   :  { %v31_v9 = vpop.xlane.xlu0 %30 }
 0x12a   :  { %108 = vrcp.f32 %v31_v9 }
 0x137   :  { %v109_v13 = vpop.eup %108 }
 0x138   :  { %v34_v14 = vmul.f32 %v109_v13, %v107_v7 }
 0x13a   :  { %v62_v15 = vsel %vm57_vm1, %v34_v14, 0.0  ;;  %v35_v16 = vmul.f32 3.0, %v34_v14 }
 0x13b   :  { %v63_v17 = vsel %vm22_vm0, %v62_v15, 0.0 }
 0x13c   :  { %64 = vadd.xlane.f32.xlu1 %v63_v17  ;;  %v36_v18 = vadd.f32 4e-07, %v35_v16 }
 0x13e   :  { %110 = vrcp.f32 %v36_v18 }
 0x14b   :  { %v111_v19 = vpop.eup %110 }
 0x14c   :  { %v39_v20 = vmul.f32 %v111_v19, %v35_v16  ;;  %v40_v21 = vmul.f32 1e-07, %v111_v19 }
 0x14e   :  { %v41_v22 = vadd.f32 1e-07, %v39_v20  ;;  %v45_v23 = vadd.f32 1e-07, %v40_v21 }
 0x150   :  { %112 = vlog2.f32 %v41_v22 }
 0x151   :  { %114 = vlog2.f32 %v45_v23 }
 0x15d   :  { %v113_v24 = vpop.eup %112 }
 0x15e   :  { %v115_v25 = vpop.eup %114  ;;  %v43_v26 = vmul.f32 0.6931472, %v113_v24 }
 0x15f   :  { %v47_v27 = vmul.f32 0.6931472, %v115_v25 }
 0x160   :  { %v44_v29 = vmul.f32 %v43_v26, %v39_v20 }
 0x161   :  { %v48_v28 = vmul.f32 %v47_v27, %v40_v21 }
 0x163   :  { %v49_v30 = vmul.f32 3.0, %v48_v28 }
 0x165   :  { %v50_v31 = vadd.f32 %v49_v30, %v44_v29 }
 0x167   :  { %v58_v32 = vsel %vm57_vm1, 0.0, %v50_v31 }
 0x168   :  { %v59_v33 = vsel %vm22_vm0, %v58_v32, 0.0 }
 0x169   :  { %60 = vadd.xlane.f32.xlu0 %v59_v33 }
 0x1c5   :  { %v65_v34 = vpop.xlane.xlu1 %64 }
 0x1c6   :  { %v66_v35 = vadd.f32 1e-07, %v65_v34 }
 0x1f2   :  { %v61_v36 = vpop.xlane.xlu0 %60 }
 0x1f3   :  { %v67_v37 = vmul.f32 %v66_v35, %v61_v36 }
 0x1f5   :  { %v70_v38 = vsel %vm69_vm2, %v67_v37, 0.0 }
 0x1f6   :  { %71 = vadd.xlane.f32.xlu0 %v70_v38 }
 0x27f   :  { %v72_v39 = vpop.xlane.xlu0 %71 }
 0x280   :  { %v73_v40 = vrot.slane %v72_v39, 4 }
 0x282   :  { %v74_v41 = vadd.f32 %v73_v40, %v72_v39 }
 0x284   :  { %v75_v42 = vrot.slane %v74_v41, 2 }
 0x286   :  { %v76_v43 = vadd.f32 %v75_v42, %v74_v41 }
 0x288   :  { %v77_v44 = vrot.slane %v76_v43, 1 }
 0x28a   :  { %v78_v45 = vadd.f32 %v77_v44, %v76_v43 }
 0x28c   :  { %100 = vpush %v78_v45 }
 0x2bd   :  { %s101_s13 = spop %100 }
 0x2be   :  { %v83_v47 = vstv %s101_s13 }
 0x2bf   :  { %v84_v48 = vsel %vm82_vm5, %v83_v47, 0.0 }
 0x2c0   :  { %85 = vst [vmem:[#allocation2] sm:$0xff] %v84_v48 }
 0x2c1   :  { %127 = shalt.err (!%p124_p4)
}
 0x2c2   :  { %95 = dma.vmem_to_hbm [thread:$0]  %s93_s1, 128, %s172_s2, [#allocation3]  }
 0x2c3   :  { %136 = dma.done.wait [#allocation3], 128  }
 0x2c4   :  { %137 = vsyncadd [#allocation3], 4294967168 }
 0x2c5   :  { %99 = vsyncpa [#allocation3], 1 }

</bundles_post_ra>
